<compile_context>
chip_gen: v5e
topology: v5e:2x2
jax: 0.10.0
libtpu: 0.0.40
codegen_flags: <defaults>
</compile_context>

<pallas_src>
import functools

import jax
import jax.numpy as jnp
from jax import lax
from jax.experimental import pallas as pl
from jax.experimental.pallas import tpu as pltpu


def self_attention_kernel(x_ref, w_ref, o_ref, *, mxu_dtype):
    # x_ref: (seq, d_in)   -- leading batch dim squeezed away by the BlockSpec
    # w_ref: (3, d_in, d_out), layout [W_q * 1/sqrt(d_out), W_k, W_v]
    # o_ref: (seq, d_out)
    x = x_ref[...].astype(mxu_dtype)

    # Three small projections. Weight tiles are loaded by indexing the leading
    # (untiled) axis, so there are no lane-offset extracts anywhere.
    q = jnp.dot(x, w_ref[0].astype(mxu_dtype), preferred_element_type=jnp.float32)
    k = jnp.dot(x, w_ref[1].astype(mxu_dtype), preferred_element_type=jnp.float32)
    v = jnp.dot(x, w_ref[2].astype(mxu_dtype), preferred_element_type=jnp.float32)

    # scores = q @ k^T via contraction dims (MXU transpose_rhs) — no XLU transpose.
    # The 1/sqrt(d_out) scale is already folded into W_q, so scores arrive scaled.
    scores = lax.dot_general(
        q.astype(mxu_dtype), k.astype(mxu_dtype),
        dimension_numbers=(((1,), (1,)), ((), ())),
        preferred_element_type=jnp.float32,
    )  # (seq, seq), f32

    # Numerically-stable softmax over the last axis, all in f32 (exact divide:
    # the EUP is idle at this size, the approximate reciprocal buys nothing).
    m = jnp.max(scores, axis=-1, keepdims=True)
    e = jnp.exp(scores - m)
    attn = e / jnp.sum(e, axis=-1, keepdims=True)

    # Context vectors, written directly at the true (seq, d_out) width.
    o_ref[...] = jnp.dot(
        attn.astype(mxu_dtype), v.astype(mxu_dtype),
        preferred_element_type=jnp.float32,
    ).astype(o_ref.dtype)


def make_self_attention_v1(w_q, w_k, w_v, *, mxu_dtype=jnp.float32):
    """One-time weight prep (out of the hot path); returns a jitted apply(x).

    Pass mxu_dtype=jnp.bfloat16 on v6e/v7x at non-toy sizes for ~3x MXU throughput
    (accumulation stays f32); keep the default f32 when exact parity with an f32
    reference matters.
    """
    d_in, d_out = w_q.shape
    scale = 1.0 / (d_out ** 0.5)  # keys.shape[-1] ** 0.5 in the PyTorch module
    # Fold the softmax scale into the Q weight columns; stack into one slab so the
    # kernel takes a single weight input (single DMA, no per-call concat/pad).
    w_stack = jnp.stack([w_q * scale, w_k, w_v], axis=0)  # (3, d_in, d_out)

    kernel = functools.partial(self_attention_kernel, mxu_dtype=mxu_dtype)

    @jax.jit
    def apply(x):
        squeeze = x.ndim == 2
        xb = x[None] if squeeze else x            # (B, seq, d_in)
        b, seq, _ = xb.shape

        out = pl.pallas_call(
            kernel,
            out_shape=jax.ShapeDtypeStruct((b, seq, d_out), xb.dtype),
            grid=(b,),
            in_specs=[
                # Per-batch tile; leading dim squeezed so the kernel sees (seq, d_in).
                pl.BlockSpec((pl.Squeezed(), seq, d_in), lambda i: (i, 0, 0)),
                # Full weight slab, identical for every grid step.
                pl.BlockSpec((3, d_in, d_out), lambda i: (0, 0, 0)),
            ],
            out_specs=pl.BlockSpec((pl.Squeezed(), seq, d_out), lambda i: (i, 0, 0)),
            compiler_params=pltpu.CompilerParams(
                # Independent batch items -> shard across v7x's 2 TensorCores.
                dimension_semantics=("parallel",),
            ),
        )(xb, w_stack)

        return out[0] if squeeze else out

    return apply


def self_attention_ref(x, w_q, w_k, w_v):
    q = x @ w_q
    k = x @ w_k
    v = x @ w_v
    scores = (q @ k.T) / (k.shape[-1] ** 0.5)
    attn = jax.nn.softmax(scores, axis=-1)
    return attn @ v


if __name__ == "__main__":
    seq, d_in, d_out = 8, 32, 16

    key = jax.random.PRNGKey(0)
    kx, kq, kk, kv, kb = jax.random.split(key, 5)

    x = jax.random.normal(kx, (seq, d_in), dtype=jnp.float32)
    # Deterministic "torch.randn"-style parameter init.
    w_q = jax.random.normal(kq, (d_in, d_out), dtype=jnp.float32)
    w_k = jax.random.normal(kk, (d_in, d_out), dtype=jnp.float32)
    w_v = jax.random.normal(kv, (d_in, d_out), dtype=jnp.float32)

    attn_fn = make_self_attention_v1(w_q, w_k, w_v)  # weight prep happens here, once

    # Unbatched path — exact shape/semantics of the PyTorch module's forward.
    out = jax.block_until_ready(attn_fn(x))
    ref = self_attention_ref(x, w_q, w_k, w_v)
    assert out.shape == (seq, d_out)
    assert jnp.allclose(out, ref, atol=1e-2, rtol=1e-2), "unbatched mismatch vs reference"

    # Batched (batch*heads-style) path — grid axis amortizes per-call overhead and
    # is marked "parallel" for v7x's second TensorCore.
    batch = 4
    xb = jax.random.normal(kb, (batch, seq, d_in), dtype=jnp.float32)
    outb = jax.block_until_ready(attn_fn(xb))
    refb = jax.vmap(lambda xi: self_attention_ref(xi, w_q, w_k, w_v))(xb)
    assert outb.shape == (batch, seq, d_out)
    assert jnp.allclose(outb, refb, atol=1e-2, rtol=1e-2), "batched mismatch vs reference"

    print("KERNEL_OK")
</pallas_src>

<mosaic_0001>
module attributes {stable_mosaic.version = 11 : i64} {
  func.func @self_attention_kernel(%arg0: i32, %arg1: memref<1x8x32xf32, #tpu.memory_space<vmem>>, %arg2: memref<3x32x16xf32, #tpu.memory_space<vmem>>, %arg3: memref<1x8x16xf32, #tpu.memory_space<vmem>>) attributes {dimension_semantics = [#tpu.dimension_semantics<parallel>], iteration_bounds = array<i64: 1>, scalar_prefetch = 0 : i64, scratch_operands = 0 : i64, tpu.core_type = #tpu.core_type<tc>, window_params = [{transform_indices = @transform_0, window_bounds = array<i64: 1, 8, 32>}, {pipeline_mode = #tpu.pipeline_mode<synchronous>, transform_indices = @transform_1, window_bounds = array<i64: 3, 32, 16>}, {transform_indices = @transform_2, window_bounds = array<i64: 1, 8, 16>}]} {
    %c0 = arith.constant 0 : index
    %c0_0 = arith.constant 0 : index
    %c0_1 = arith.constant 0 : index
    %0 = vector.load %arg1[%c0, %c0_0, %c0_1] : memref<1x8x32xf32, #tpu.memory_space<vmem>>, vector<1x8x32xf32>
    %1 = vector.shape_cast %0 : vector<1x8x32xf32> to vector<8x32xf32>
    %c0_2 = arith.constant 0 : index
    %c0_3 = arith.constant 0 : index
    %c0_4 = arith.constant 0 : index
    %2 = vector.load %arg2[%c0_2, %c0_3, %c0_4] : memref<3x32x16xf32, #tpu.memory_space<vmem>>, vector<1x32x16xf32>
    %3 = vector.shape_cast %2 : vector<1x32x16xf32> to vector<32x16xf32>
    %cst = arith.constant dense<0.000000e+00> : vector<8x16xf32>
    %4 = tpu.matmul %1, %3, %cst {dimension_numbers = #tpu.dot_dimension_numbers<[1], [0], [0], [1], [0, 0, 1, 1], [], []>} : vector<8x32xf32>, vector<32x16xf32>, vector<8x16xf32> -> vector<8x16xf32>
    %c1 = arith.constant 1 : index
    %c0_5 = arith.constant 0 : index
    %c0_6 = arith.constant 0 : index
    %5 = vector.load %arg2[%c1, %c0_5, %c0_6] : memref<3x32x16xf32, #tpu.memory_space<vmem>>, vector<1x32x16xf32>
    %6 = vector.shape_cast %5 : vector<1x32x16xf32> to vector<32x16xf32>
    %cst_7 = arith.constant dense<0.000000e+00> : vector<8x16xf32>
    %7 = tpu.matmul %1, %6, %cst_7 {dimension_numbers = #tpu.dot_dimension_numbers<[1], [0], [0], [1], [0, 0, 1, 1], [], []>} : vector<8x32xf32>, vector<32x16xf32>, vector<8x16xf32> -> vector<8x16xf32>
    %c2 = arith.constant 2 : index
    %c0_8 = arith.constant 0 : index
    %c0_9 = arith.constant 0 : index
    %8 = vector.load %arg2[%c2, %c0_8, %c0_9] : memref<3x32x16xf32, #tpu.memory_space<vmem>>, vector<1x32x16xf32>
    %9 = vector.shape_cast %8 : vector<1x32x16xf32> to vector<32x16xf32>
    %cst_10 = arith.constant dense<0.000000e+00> : vector<8x16xf32>
    %10 = tpu.matmul %1, %9, %cst_10 {dimension_numbers = #tpu.dot_dimension_numbers<[1], [0], [0], [1], [0, 0, 1, 1], [], []>} : vector<8x32xf32>, vector<32x16xf32>, vector<8x16xf32> -> vector<8x16xf32>
    %cst_11 = arith.constant dense<0.000000e+00> : vector<8x8xf32>
    %11 = tpu.matmul %4, %7, %cst_11 {dimension_numbers = #tpu.dot_dimension_numbers<[1], [1], [0], [0], [0, 0, 1, 0], [], []>} : vector<8x16xf32>, vector<8x16xf32>, vector<8x8xf32> -> vector<8x8xf32>
    %cst_12 = arith.constant dense<0xFF800000> : vector<8xf32>
    %12 = vector.multi_reduction <maximumf>, %11, %cst_12 [1] : vector<8x8xf32> to vector<8xf32>
    %13 = vector.shape_cast %12 : vector<8xf32> to vector<8x1xf32>
    %14 = vector.broadcast %13 : vector<8x1xf32> to vector<8x8xf32>
    %15 = arith.subf %11, %14 : vector<8x8xf32>
    %16 = math.exp %15 : vector<8x8xf32>
    %cst_13 = arith.constant dense<0.000000e+00> : vector<8xf32>
    %17 = vector.multi_reduction <add>, %16, %cst_13 [1] : vector<8x8xf32> to vector<8xf32>
    %18 = vector.shape_cast %17 : vector<8xf32> to vector<8x1xf32>
    %19 = vector.broadcast %18 : vector<8x1xf32> to vector<8x8xf32>
    %20 = arith.divf %16, %19 : vector<8x8xf32>
    %cst_14 = arith.constant dense<0.000000e+00> : vector<8x16xf32>
    %21 = tpu.matmul %20, %10, %cst_14 {dimension_numbers = #tpu.dot_dimension_numbers<[1], [0], [0], [1], [0, 0, 1, 1], [], []>} : vector<8x8xf32>, vector<8x16xf32>, vector<8x16xf32> -> vector<8x16xf32>
    %c0_15 = arith.constant 0 : index
    %c0_16 = arith.constant 0 : index
    %c0_17 = arith.constant 0 : index
    %22 = vector.load %arg3[%c0_15, %c0_16, %c0_17] : memref<1x8x16xf32, #tpu.memory_space<vmem>>, vector<1x8x16xf32>
    %23 = vector.shape_cast %22 : vector<1x8x16xf32> to vector<8x16xf32>
    %24 = vector.shape_cast %21 : vector<8x16xf32> to vector<1x8x16xf32>
    tpu.vector_store %arg3[%c0_15, %c0_16, %c0_17], %24 {strides = array<i32>} : memref<1x8x16xf32, #tpu.memory_space<vmem>>, vector<1x8x16xf32>,
    return
  }
  func.func @transform_0(%arg0: i32) -> (i32, i32, i32) {
    %c0_i32 = arith.constant 0 : i32
    %c0_i32_0 = arith.constant 0 : i32
    %c0_i32_1 = arith.constant 0 : i32
    return %arg0, %c0_i32, %c0_i32_0 : i32, i32, i32
  }
  func.func @transform_1(%arg0: i32) -> (i32, i32, i32) {
    %c0_i32 = arith.constant 0 : i32
    %c0_i32_0 = arith.constant 0 : i32
    %c0_i32_1 = arith.constant 0 : i32
    %c0_i32_2 = arith.constant 0 : i32
    return %c0_i32, %c0_i32_0, %c0_i32_1 : i32, i32, i32
  }
  func.func @transform_2(%arg0: i32) -> (i32, i32, i32) {
    %c0_i32 = arith.constant 0 : i32
    %c0_i32_0 = arith.constant 0 : i32
    %c0_i32_1 = arith.constant 0 : i32
    return %arg0, %c0_i32, %c0_i32_0 : i32, i32, i32
  }
}

</mosaic_0001>

<bundles_post_ra>
// kernel: apply.1
= control target key start
LH: loop header
LB: loop body
LE: loop exit
PB: predicated region body
PF: predicated region fallthrough
CT: control target
= control target key end

     0   :  { %7 = vsyncpa [#allocation3], 0  ;;  %s346_s0 = inlined_call_operand.hbm [shape: f32[1,8,32], index: 0, kind: input, shape index: {}]   ;;  %s347_s1 = inlined_call_operand.hbm [shape: f32[3,32,16], index: 1, kind: input, shape index: {}]   ;;  %s348_s2 = inlined_call_operand.hbm [shape: f32[1,8,16], index: 2, kind: output, shape index: {}]  }
   0x1   :  { %8 = vsyncpa [#allocation6], 0 }
   0x2   :  { %9 = vsyncpa [#allocation4], 0  ;;  %s15_s11 = sshll.u32 %s346_s0, 4  ;;  %s308_s12 = smov [#allocation2]   ;;  %s16_s11 = int_to_ptr.hbm [resolvable:$true] %s15_s11 }
   0x3   :  { %s17_s13 = sshll.u32 %s308_s12, 4  ;;  %s25_s16 = sshll.u32 %s347_s1, 4  ;;  %s18_s13 = int_to_ptr.vmem [resolvable:$true] %s17_s13  ;;  %s26_s16 = int_to_ptr.hbm [resolvable:$true] %s25_s16 }
   0x4   :  { %20 = dma.hbm_to_vmem [thread:$0]  %s16_s11, 128, %s18_s13, [#allocation3]  }
   0x5   :  { %s309_s17 = smov [#allocation5]   ;;  %s310_s19 = smov 128  }
   0x6   :  { %s27_s18 = sshll.u32 %s309_s17, 4  ;;  %s311_s20 = smov 8   ;;  %s28_s18 = int_to_ptr.vmem [resolvable:$true] %s27_s18 }
   0x7   :  { %33 = dma.hbm_to_vmem [thread:$0]  %s26_s16, 1536, %s28_s18, [#allocation6], %s310_s19, %s310_s19, %s311_s20  }
   0x8   :  { %302 = dma.done.wait [#allocation3], 128  }
   0x9   :  { %303 = vsyncadd [#allocation3], 4294967168 }
   0xa   :  { %304 = dma.done.wait [#allocation6], 1536  }
   0xb   :  { %305 = vsyncadd [#allocation6], 4294965760  ;;  %v75_v0 = vld [vmem:[#allocation5 + $0x38] sm:$0xff]  ;;  %v74_v1 = vld [vmem:[#allocation5 + $0x30] sm:$0xff]  ;;  %vm47_vm0 = vcmask 261120   ;;  %vm121_vm1 = vcmask 130048  }
   0xc   :  { %v46_v2 = vld [vmem:[#allocation5 + $0x18] sm:$0xff]  ;;  %88 = vmatpush.msra.mxu1 %v75_v0  ;;  %v45_v3 = vld [vmem:[#allocation5 + $0x10] sm:$0xff]  ;;  %v73_v4 = vld [vmem:[#allocation5 + $0x28] sm:$0xff]  ;;  %vm148_vm2 = vcmask 64512   ;;  %s312_s0 = smov [#allocation7]   ;;  %s204_s23 = sshll.u32 %s348_s2, 4  ;;  %s205_s23 = int_to_ptr.hbm [resolvable:$true] %s204_s23 }
   0xd   :  { %63 = vmatpush.msra.mxu0 %v46_v2  ;;  %v44_v5 = vld [vmem:[#allocation5 + $0x8] sm:$0xff]  ;;  %v72_v6 = vld [vmem:[#allocation5 + $0x20] sm:$0xff]  ;;  %v42_v8 = vld [vmem:[#allocation2] sm:$0xff]  ;;  %s202_s1 = sshll.u32 %s312_s0, 4  ;;  %s203_s1 = int_to_ptr.vmem [resolvable:$true] %s202_s1 }
   0xe   :  { %89 = vmatpush.msra.mxu1 %v74_v1  ;;  %v43_v7 = vld [vmem:[#allocation5] sm:$0xff]  ;;  %v100_v13 = vld [vmem:[#allocation5 + $0x58] sm:$0xff]  ;;  %v99_v14 = vld [vmem:[#allocation5 + $0x50] sm:$0xff] }
   0xf   :  { %64 = vmatpush.msra.mxu0 %v45_v3  ;;  %113 = vmatpush.msra.mxu2 %v100_v13  ;;  %v98_v15 = vld [vmem:[#allocation5 + $0x48] sm:$0xff]  ;;  %v97_v16 = vld [vmem:[#allocation5 + $0x40] sm:$0xff] }
  0x10   :  { %90 = vmatpush.msra.mxu1 %v73_v4 }
  0x11   :  { %65 = vmatpush.msra.mxu0 %v44_v5  ;;  %114 = vmatpush.msra.mxu2 %v99_v14 }
  0x12   :  { %91 = vmatpush.msra.mxu1 %v72_v6 }
  0x13   :  { %66 = vmatpush.msra.mxu0 %v43_v7  ;;  %216 = vmatmul.msk.f32.vlgmr.msra.gmra.mxu1 %vm47_vm0, %v42_v8 }
  0x14   :  { %215 = vmatmul.msk.f32.vlgmr.msra.gmra.mxu0 %vm47_vm0, %v42_v8  ;;  %115 = vmatpush.msra.mxu2 %v98_v15 }
  0x16   :  { %116 = vmatpush.msra.mxu2 %v97_v16 }
  0x17   :  { %217 = vmatmul.msk.f32.vlgmr.msra.gmra.mxu2 %vm47_vm0, %v42_v8 }
  0x90   :  { %v93_v9 = vpop.f32.mrf.mxu1 }
  0x91   :  { %218 = vmatpush.xpose.msk.msra.mxu3 %vm121_vm1, %v93_v9  ;;  %v68_v10 = vpop.f32.mrf.mxu0 }
  0x94   :  { %219 = vmatmul.msk.f32.vlgmr.msra.gmra.mxu3 %vm121_vm1, %v68_v10 }
  0x9a   :  { %v118_v22 = vpop.f32.mrf.mxu2 }
  0x9b   :  { %191 = vmatpush.msrb.mxu3 %v118_v22 }
 0x117   :  { %v145_v11 = vpop.f32.mrf.mxu3 }
 0x118   :  { %v149_v12 = vsel %vm148_vm2, %v145_v11, -inf }
 0x119   :  { %150 = vmax.xlane.f32.xlu0 %v149_v12 }
 0x18c   :  { %v151_v17 = vpop.xlane.xlu0 %150 }
 0x18d   :  { %v152_v18 = vsub.f32 %v145_v11, %v151_v17 }
 0x18f   :  { %v153_v19 = vmul.f32 1.442695, %v152_v18 }
 0x191   :  { %226 = vpow2.f32 %v153_v19 }
 0x197   :  { %v227_v20 = vpop.eup %226 }
 0x198   :  { %v155_v21 = vsel %vm148_vm2, %v227_v20, 0.0 }
 0x199   :  { %156 = vadd.xlane.f32.xlu0 %v155_v21 }
 0x20c   :  { %v157_v23 = vpop.xlane.xlu0 %156 }
 0x20d   :  { %228 = vrcp.f32 %v157_v23  ;;  %v169_v27 = vand.u32 2147483648, %v157_v23  ;;  %v167_v29 = vand.u32 2147483647, %v157_v23  ;;  %vm163_vm4 = vweird.f32 %v157_v23 }
 0x20f   :  { %v170_v31 = vor.u32 1.1754944e-38, %v169_v27  ;;  %vm168_vm6 = vcmp.eq.f32.partialorder %v167_v29, 8.507059e+37 }
 0x213   :  { %v229_v24 = vpop.eup %228 }
 0x214   :  { %v159_v25 = vmul.f32 %v229_v24, %v157_v23  ;;  %vm164_vm3 = vweird.f32 %v229_v24 }
 0x215   :  { %vm165_vm5 = vmor %vm163_vm4, %vm164_vm3 }
 0x216   :  { %v160_v26 = vsub.f32 1.0, %v159_v25 }
 0x218   :  { %v161_v28 = vmul.f32 %v229_v24, %v160_v26 }
 0x21a   :  { %v162_v30 = vadd.f32 %v229_v24, %v161_v28 }
 0x21c   :  { %v166_v32 = vsel %vm165_vm5, %v229_v24, %v162_v30 }
 0x21d   :  { %v171_v33 = vsel %vm168_vm6, %v170_v31, %v166_v32 }
 0x21e   :  { %v172_v34 = vmul.f32 %v227_v20, %v171_v33 }
 0x220   :  { %220 = vmatmul.msk.f32.vlgmr.msrb.gmra.mxu3 %vm148_vm2, %v172_v34 }
 0x2a3   :  { %v193_v35 = vpop.f32.mrf.mxu3 }
 0x2a4   :  { %196 = vst.msk [vmem:[#allocation7] sm:$0xff] %vm121_vm1, %v193_v35 }
 0x2a5   :  { %207 = dma.vmem_to_hbm [thread:$0]  %s203_s1, 128, %s205_s23, [#allocation4]  }
 0x2a6   :  { %306 = dma.done.wait [#allocation4], 128  }
 0x2a7   :  { %307 = vsyncadd [#allocation4], 4294967168 }
 0x2a8   :  { %212 = vsyncpa [#allocation3], 1 }
 0x2a9   :  { %213 = vsyncpa [#allocation6], 1 }
 0x2aa   :  { %214 = vsyncpa [#allocation4], 1 }

</bundles_post_ra>
